<compile_context>
chip_gen: v7x
topology: tpu7x:2x2x1
jax: 0.10.0
libtpu: 0.0.40
codegen_flags: <defaults>
</compile_context>

<pallas_src>
import functools

import jax
import jax.numpy as jnp
from jax.experimental import pallas as pl
from jax.experimental.pallas import tpu as pltpu

BN_EPS = 1e-5


def _round_up(n, m):
    return ((n + m - 1) // m) * m


def _critic_kernel(sa_ref, w_ref, vec_ref, out_ref, cat_ref, *,
                   S_pad, A_pad, H):
    # sa_ref : (B, S_pad + A_pad) f32, [state | 0-pad | action | 0-pad]
    # w_ref  : (S_pad + A_pad + H + A_pad, H) bf16 packed weights
    #            rows [0 : SA)              = W1 extended (action/pad rows = 0)
    #            rows [SA : SA + H + A_pad) = W2, ordered [hn-rows | action-rows(+pad)]
    #          (all boundaries multiples of 16 -> zero-cost bf16 views)
    # vec_ref: (8, H) f32: b1, b2_eff(beta folded), gamma, w3, b3-broadcast
    # cat_ref: (B, H + A_pad) bf16 VMEM scratch: layer-2 LHS [hn | action]
    SA = S_pad + A_pad

    sa = sa_ref[...].astype(jnp.bfloat16)          # bf16 for the MXU only

    b1 = vec_ref[0:1, :]
    b2 = vec_ref[1:2, :]                           # beta already folded in
    gamma = vec_ref[2:3, :]
    w3_row = vec_ref[3:4, :]
    b3_row = vec_ref[4:5, :]

    # ---- layer 1: tanh(state @ W1 + b1) ----------------------------------
    # Full combined operand vs zero-extended W1: no input lane-slicing needed.
    h1 = jnp.tanh(
        jnp.dot(sa, w_ref[0:SA, :], preferred_element_type=jnp.float32) + b1)

    # ---- BatchNorm1d (training mode: batch mean, biased variance) --------
    mean = jnp.mean(h1, axis=0, keepdims=True)
    centered = h1 - mean
    var = jnp.mean(centered * centered, axis=0, keepdims=True)
    scale = jax.lax.rsqrt(var + BN_EPS) * gamma    # gamma folded into scale
    hn = centered * scale                          # beta folded into b2_eff

    # ---- layer 2: ONE fused matmul over [hn | action] --------------------
    cat_ref[:, 0:H] = hn.astype(jnp.bfloat16)
    cat_ref[:, H:H + A_pad] = sa[:, S_pad:SA]      # action (+ zero pad) columns
    h2 = jnp.tanh(
        jnp.dot(cat_ref[...], w_ref[SA:SA + H + A_pad, :],
                preferred_element_type=jnp.float32) + b2)

    # ---- layer 3: Linear(H -> 1) as VPU multiply + lane reduce -----------
    out_ref[...] = jnp.sum(h2 * w3_row, axis=-1, keepdims=True) + b3_row[:, 0:1]


def init_critic_params(key, state_dim, action_dim):
    """PyTorch-style params; weights stored transposed as [in, out]."""
    sa = state_dim + action_dim
    hidden_dim = 1 if sa == 0 else 2 ** (sa - 1).bit_length()
    ks = jax.random.split(key, 6)

    def uniform(k, shape, fan_in):
        bound = 1.0 / float(max(fan_in, 1)) ** 0.5
        return jax.random.uniform(k, shape, jnp.float32, -bound, bound)

    params = {
        "w1": uniform(ks[0], (state_dim, hidden_dim), state_dim),
        "b1": uniform(ks[1], (hidden_dim,), state_dim),
        "w2": uniform(ks[2], (hidden_dim + action_dim, hidden_dim),
                      hidden_dim + action_dim),
        "b2": uniform(ks[3], (hidden_dim,), hidden_dim + action_dim),
        "w3": uniform(ks[4], (hidden_dim, 1), hidden_dim),
        "b3": uniform(ks[5], (1,), hidden_dim),
        "gamma": jnp.ones((hidden_dim,), jnp.float32),
        "beta": jnp.zeros((hidden_dim,), jnp.float32),
    }
    return params, hidden_dim


def pack_critic_params(params, state_dim, action_dim, hidden_dim):
    """Consolidate parameters into one bf16 slab + one small f32 slab (2 DMAs)."""
    S, A, H = state_dim, action_dim, hidden_dim
    # bf16 packs 2 rows/sublane -> native tile (16, 128).  All slab row-slice
    # boundaries must be multiples of 16 to stay zero-cost views.
    S_pad = _round_up(S, 16)
    A_pad = _round_up(A, 16)
    SA = S_pad + A_pad

    # W1 extended over the full [state | action] input; action/pad rows are 0.
    w1_ext = jnp.zeros((SA, H), jnp.float32).at[:S].set(params["w1"])
    # W2 ordered [hn-rows | action-rows (+ zero pad)].
    w2a = params["w2"][:H]
    w2b_p = jnp.zeros((A_pad, H), jnp.float32).at[:A].set(params["w2"][H:])
    w_slab = jnp.concatenate([w1_ext, w2a, w2b_p], axis=0).astype(jnp.bfloat16)

    # Fold BN beta into the layer-2 bias: (cs + beta) @ W2a == cs @ W2a + beta @ W2a.
    b2_eff = params["b2"] + params["beta"] @ params["w2"][:H]

    vec = jnp.zeros((8, H), jnp.float32)
    vec = vec.at[0].set(params["b1"])
    vec = vec.at[1].set(b2_eff)
    vec = vec.at[2].set(params["gamma"])
    vec = vec.at[3].set(params["w3"].reshape(-1))
    vec = vec.at[4].set(jnp.full((H,), params["b3"].reshape(())))

    return {"w_slab": w_slab, "vec_slab": vec,
            "state_dim": S, "action_dim": A, "hidden_dim": H,
            "S_pad": S_pad, "A_pad": A_pad}


def critic_forward(state, action, packed):
    """Run the Critic forward pass as a single gridless Pallas kernel."""
    S, A, H = packed["state_dim"], packed["action_dim"], packed["hidden_dim"]
    S_pad, A_pad = packed["S_pad"], packed["A_pad"]
    SA = S_pad + A_pad
    B = state.shape[0]

    # Single combined, padded input operand (one DMA instead of two).
    sa = jnp.zeros((B, SA), jnp.float32)
    sa = sa.at[:, :S].set(state.astype(jnp.float32))
    sa = sa.at[:, S_pad:S_pad + A].set(action.astype(jnp.float32))

    kernel = functools.partial(_critic_kernel, S_pad=S_pad, A_pad=A_pad, H=H)
    vmem = pl.BlockSpec(memory_space=pltpu.VMEM)
    return pl.pallas_call(
        kernel,
        out_shape=jax.ShapeDtypeStruct((B, 1), jnp.float32),
        in_specs=[vmem, vmem, vmem],
        out_specs=vmem,
        scratch_shapes=[pltpu.VMEM((B, H + A_pad), jnp.bfloat16)],
    )(sa, packed["w_slab"], packed["vec_slab"])


def critic_forward_ref(state, action, params):
    """Faithful f32 reference matching the PyTorch module."""
    h1 = jnp.tanh(state.astype(jnp.float32) @ params["w1"] + params["b1"])
    mean = jnp.mean(h1, axis=0, keepdims=True)
    var = jnp.mean((h1 - mean) ** 2, axis=0, keepdims=True)
    hn = (h1 - mean) * jax.lax.rsqrt(var + BN_EPS) * params["gamma"] + params["beta"]
    cat = jnp.concatenate([hn, action.astype(jnp.float32)], axis=1)
    h2 = jnp.tanh(cat @ params["w2"] + params["b2"])
    return h2 @ params["w3"] + params["b3"]


def critic_forward_ref_bf16(state, action, params):
    """Reference mirroring the kernel's bf16 MXU rounding points and beta fold."""
    H = params["w1"].shape[1]
    bf = jnp.bfloat16
    h1 = jnp.tanh(jnp.dot(state.astype(jnp.float32).astype(bf),
                          params["w1"].astype(bf),
                          preferred_element_type=jnp.float32) + params["b1"])
    mean = jnp.mean(h1, axis=0, keepdims=True)
    centered = h1 - mean
    var = jnp.mean(centered * centered, axis=0, keepdims=True)
    hn = centered * (jax.lax.rsqrt(var + BN_EPS) * params["gamma"])
    b2_eff = params["b2"] + params["beta"] @ params["w2"][:H]
    h2 = jnp.tanh(
        jnp.dot(hn.astype(bf), params["w2"][:H].astype(bf),
                preferred_element_type=jnp.float32)
        + jnp.dot(action.astype(jnp.float32).astype(bf), params["w2"][H:].astype(bf),
                  preferred_element_type=jnp.float32)
        + b2_eff)
    return h2 @ params["w3"] + params["b3"]


if __name__ == "__main__":
    key = jax.random.PRNGKey(0)
    k_params, k_state, k_action, k_gamma, k_beta = jax.random.split(key, 5)

    batch = 64
    state_dim = 24
    action_dim = 8   # -> hidden_dim = 32

    params, hidden_dim = init_critic_params(k_params, state_dim, action_dim)
    # Perturb the BN affine params so gamma/beta (and the pack-time beta fold)
    # are genuinely exercised, not just identity/zero.
    params["gamma"] = params["gamma"] + 0.1 * jax.random.normal(
        k_gamma, (hidden_dim,), jnp.float32)
    params["beta"] = 0.1 * jax.random.normal(k_beta, (hidden_dim,), jnp.float32)

    packed = pack_critic_params(params, state_dim, action_dim, hidden_dim)

    state = jax.random.normal(k_state, (batch, state_dim), jnp.float32)
    action = jax.random.normal(k_action, (batch, action_dim), jnp.float32)

    q = jax.block_until_ready(critic_forward(state, action, packed))

    # Tight check vs a reference using the same bf16 MXU operands / beta fold.
    q_ref_bf16 = critic_forward_ref_bf16(state, action, params)
    # Loose check vs the full-f32 PyTorch-faithful reference.
    q_ref_f32 = critic_forward_ref(state, action, params)

    assert q.shape == (batch, 1), q.shape
    assert jnp.allclose(q, q_ref_bf16, atol=1e-4, rtol=1e-4), (
        float(jnp.max(jnp.abs(q - q_ref_bf16))))
    assert jnp.allclose(q, q_ref_f32, atol=5e-2, rtol=5e-2), (
        float(jnp.max(jnp.abs(q - q_ref_f32))))

    print("KERNEL_OK")
</pallas_src>

<mosaic_0001>
module attributes {stable_mosaic.version = 11 : i64} {
  func.func @_critic_kernel(%arg0: memref<64x48xf32, #tpu.memory_space<vmem>>, %arg1: memref<96x32xbf16, #tpu.memory_space<vmem>>, %arg2: memref<8x32xf32, #tpu.memory_space<vmem>>, %arg3: memref<64x1xf32, #tpu.memory_space<vmem>>, %arg4: memref<64x48xbf16, #tpu.memory_space<vmem>>) attributes {dimension_semantics = [], scalar_prefetch = 0 : i64, scratch_operands = 1 : i64, tpu.core_type = #tpu.core_type<tc>} {
    %c0 = arith.constant 0 : index
    %c0_0 = arith.constant 0 : index
    %0 = vector.load %arg0[%c0, %c0_0] : memref<64x48xf32, #tpu.memory_space<vmem>>, vector<64x48xf32>
    %1 = arith.truncf %0 : vector<64x48xf32> to vector<64x48xbf16>
    %c0_1 = arith.constant 0 : index
    %c0_2 = arith.constant 0 : index
    %2 = vector.load %arg2[%c0_1, %c0_2] : memref<8x32xf32, #tpu.memory_space<vmem>>, vector<1x32xf32>
    %c1 = arith.constant 1 : index
    %c0_3 = arith.constant 0 : index
    %3 = vector.load %arg2[%c1, %c0_3] : memref<8x32xf32, #tpu.memory_space<vmem>>, vector<1x32xf32>
    %c2 = arith.constant 2 : index
    %c0_4 = arith.constant 0 : index
    %4 = vector.load %arg2[%c2, %c0_4] : memref<8x32xf32, #tpu.memory_space<vmem>>, vector<1x32xf32>
    %c3 = arith.constant 3 : index
    %c0_5 = arith.constant 0 : index
    %5 = vector.load %arg2[%c3, %c0_5] : memref<8x32xf32, #tpu.memory_space<vmem>>, vector<1x32xf32>
    %c4 = arith.constant 4 : index
    %c0_6 = arith.constant 0 : index
    %6 = vector.load %arg2[%c4, %c0_6] : memref<8x32xf32, #tpu.memory_space<vmem>>, vector<1x32xf32>
    %c0_7 = arith.constant 0 : index
    %c0_8 = arith.constant 0 : index
    %7 = vector.load %arg1[%c0_7, %c0_8] : memref<96x32xbf16, #tpu.memory_space<vmem>>, vector<48x32xbf16>
    %cst = arith.constant dense<0.000000e+00> : vector<64x32xf32>
    %8 = tpu.matmul %1, %7, %cst {dimension_numbers = #tpu.dot_dimension_numbers<[1], [0], [0], [1], [0, 0, 1, 1], [], []>} : vector<64x48xbf16>, vector<48x32xbf16>, vector<64x32xf32> -> vector<64x32xf32>
    %9 = vector.broadcast %2 : vector<1x32xf32> to vector<64x32xf32>
    %10 = arith.addf %8, %9 : vector<64x32xf32>
    %11 = math.tanh %10 : vector<64x32xf32>
    %cst_9 = arith.constant dense<0.000000e+00> : vector<32xf32>
    %12 = vector.multi_reduction <add>, %11, %cst_9 [0] : vector<64x32xf32> to vector<32xf32>
    %13 = vector.shape_cast %12 : vector<32xf32> to vector<1x32xf32>
    %cst_10 = arith.constant 6.400000e+01 : f32
    %14 = vector.broadcast %cst_10 : f32 to vector<1x32xf32>
    %15 = arith.divf %13, %14 : vector<1x32xf32>
    %16 = vector.broadcast %15 : vector<1x32xf32> to vector<64x32xf32>
    %17 = arith.subf %11, %16 : vector<64x32xf32>
    %18 = arith.mulf %17, %17 : vector<64x32xf32>
    %cst_11 = arith.constant dense<0.000000e+00> : vector<32xf32>
    %19 = vector.multi_reduction <add>, %18, %cst_11 [0] : vector<64x32xf32> to vector<32xf32>
    %20 = vector.shape_cast %19 : vector<32xf32> to vector<1x32xf32>
    %cst_12 = arith.constant 6.400000e+01 : f32
    %21 = vector.broadcast %cst_12 : f32 to vector<1x32xf32>
    %22 = arith.divf %20, %21 : vector<1x32xf32>
    %cst_13 = arith.constant 9.99999974E-6 : f32
    %23 = vector.broadcast %cst_13 : f32 to vector<1x32xf32>
    %24 = arith.addf %22, %23 : vector<1x32xf32>
    %25 = math.rsqrt %24 : vector<1x32xf32>
    %26 = arith.mulf %25, %4 : vector<1x32xf32>
    %27 = vector.broadcast %26 : vector<1x32xf32> to vector<64x32xf32>
    %28 = arith.mulf %17, %27 : vector<64x32xf32>
    %29 = arith.truncf %28 : vector<64x32xf32> to vector<64x32xbf16>
    %c0_14 = arith.constant 0 : index
    %c0_15 = arith.constant 0 : index
    %30 = vector.load %arg4[%c0_14, %c0_15] : memref<64x48xbf16, #tpu.memory_space<vmem>>, vector<64x32xbf16>
    tpu.vector_store %arg4[%c0_14, %c0_15], %29 {strides = array<i32>} : memref<64x48xbf16, #tpu.memory_space<vmem>>, vector<64x32xbf16>,
    %31 = vector.extract_strided_slice %1 {offsets = [0, 32], sizes = [64, 16], strides = [1, 1]} : vector<64x48xbf16> to vector<64x16xbf16>
    %c0_16 = arith.constant 0 : index
    %c32 = arith.constant 32 : index
    %32 = vector.load %arg4[%c0_16, %c32] : memref<64x48xbf16, #tpu.memory_space<vmem>>, vector<64x16xbf16>
    tpu.vector_store %arg4[%c0_16, %c32], %31 {strides = array<i32>} : memref<64x48xbf16, #tpu.memory_space<vmem>>, vector<64x16xbf16>,
    %c0_17 = arith.constant 0 : index
    %c0_18 = arith.constant 0 : index
    %33 = vector.load %arg4[%c0_17, %c0_18] : memref<64x48xbf16, #tpu.memory_space<vmem>>, vector<64x48xbf16>
    %c48 = arith.constant 48 : index
    %c0_19 = arith.constant 0 : index
    %34 = vector.load %arg1[%c48, %c0_19] : memref<96x32xbf16, #tpu.memory_space<vmem>>, vector<48x32xbf16>
    %cst_20 = arith.constant dense<0.000000e+00> : vector<64x32xf32>
    %35 = tpu.matmul %33, %34, %cst_20 {dimension_numbers = #tpu.dot_dimension_numbers<[1], [0], [0], [1], [0, 0, 1, 1], [], []>} : vector<64x48xbf16>, vector<48x32xbf16>, vector<64x32xf32> -> vector<64x32xf32>
    %36 = vector.broadcast %3 : vector<1x32xf32> to vector<64x32xf32>
    %37 = arith.addf %35, %36 : vector<64x32xf32>
    %38 = math.tanh %37 : vector<64x32xf32>
    %39 = vector.broadcast %5 : vector<1x32xf32> to vector<64x32xf32>
    %40 = arith.mulf %38, %39 : vector<64x32xf32>
    %cst_21 = arith.constant dense<0.000000e+00> : vector<64xf32>
    %41 = vector.multi_reduction <add>, %40, %cst_21 [1] : vector<64x32xf32> to vector<64xf32>
    %42 = vector.shape_cast %41 : vector<64xf32> to vector<64x1xf32>
    %43 = vector.extract_strided_slice %6 {offsets = [0, 0], sizes = [1, 1], strides = [1, 1]} : vector<1x32xf32> to vector<1x1xf32>
    %44 = vector.broadcast %43 : vector<1x1xf32> to vector<64x1xf32>
    %45 = arith.addf %42, %44 : vector<64x1xf32>
    %c0_22 = arith.constant 0 : index
    %c0_23 = arith.constant 0 : index
    %46 = vector.load %arg3[%c0_22, %c0_23] : memref<64x1xf32, #tpu.memory_space<vmem>>, vector<64x1xf32>
    tpu.vector_store %arg3[%c0_22, %c0_23], %45 {strides = array<i32>} : memref<64x1xf32, #tpu.memory_space<vmem>>, vector<64x1xf32>,
    return
  }
}

</mosaic_0001>

<bundles_post_ra>
// kernel: tpu_custom_call.1
= control target key start
LH: loop header
LB: loop body
LE: loop exit
PB: predicated region body
PF: predicated region fallthrough
CT: control target
= control target key end

     0   :  { %vm60_vm0 = vcmask 392192   ;;  %vm146_vm1 = vcmask 261120   ;;  %vm231_vm2 = vcmask 392448   ;;  %vm401_vm3 = vcmask 7168   ;;  %s675_s1 = inlined_call_operand.vmem [shape: bf16[96,32], index: 1, kind: input, shape index: {}]   ;;  %s676_s0 = inlined_call_operand.vmem [shape: f32[64,48], index: 0, kind: input, shape index: {}]   ;;  %s677_s2 = inlined_call_operand.vmem [shape: f32[8,32], index: 2, kind: input, shape index: {}]   ;;  %s678_s3 = inlined_call_operand.vmem [shape: f32[64,1], index: 3, kind: output, shape index: {}]  }
   0x1   :  { %v474_v0 = vld [vmem:[%s675_s1] sm:$0xff]   ;;  %v475_v1 = vld [vmem:[%s675_s1 + $0x8] sm:$0xff]   ;;  %v476_v4 = vld [vmem:[%s675_s1 + $0x10] sm:$0xff]  }
   0x2   :  { %446 = vmatprep.subr.bf16.mxu0 %v474_v0  ;;  %v15_v2 = vld [vmem:[%s676_s0] sm:$0xff]  ;;  %v16_v3 = vld [vmem:[%s676_s0 + $0x8] sm:$0xff]  ;;  %v17_v6 = vld [vmem:[%s676_s0 + $0x10] sm:$0xff] }
   0x3   :  { %447 = vmatpush3.bf16.msra.mxu0 %v474_v0  ;;  %v549_v5 = vpack.c.bf16 %v16_v3, %v15_v2  ;;  %v18_v7 = vld [vmem:[%s676_s0 + $0x18] sm:$0xff]  ;;  %v19_v8 = vld [vmem:[%s676_s0 + $0x20] sm:$0xff]  ;;  %v20_v9 = vld [vmem:[%s676_s0 + $0x28] sm:$0xff] }
   0x4   :  { %448 = vmatprep.subr.bf16.mxu0 %v475_v1  ;;  %v565_v10 = vpack.c.bf16 %v18_v7, %v17_v6  ;;  %v567_v11 = vpack.c.bf16 %v20_v9, %v19_v8  ;;  %v21_v12 = vld [vmem:[%s676_s0 + $0x30] sm:$0xff]  ;;  %v22_v13 = vld [vmem:[%s676_s0 + $0x38] sm:$0xff]  ;;  %v478_v16 = vld [vmem:[%s675_s1 + $0x20] sm:$0xff]  }
   0x5   :  { %452 = vmatprep.mubr.msk.bf16.mxu0 %vm60_vm0, %v549_v5  ;;  %v579_v14 = vpack.c.bf16 %v22_v13, %v21_v12  ;;  %v477_v15 = vld [vmem:[%s675_s1 + $0x18] sm:$0xff]   ;;  %v479_v17 = vld [vmem:[%s675_s1 + $0x28] sm:$0xff]   ;;  %v414_v18 = vld [vmem:[%s677_s2] ss:$0 sm:$0xff] }
   0x6   :  { %460 = vmatprep.subr.bf16.mxu1 %v477_v15 }
   0x7   :  { %449 = vmatpush3.bf16.msra.mxu0 %v475_v1  ;;  %461 = vmatpush3.bf16.msra.mxu1 %v477_v15 }
   0x8   :  { %450 = vmatprep.subr.bf16.mxu0 %v476_v4  ;;  %462 = vmatprep.subr.bf16.mxu1 %v478_v16 }
   0xb   :  { %451 = vmatpush3.bf16.msra.mxu0 %v476_v4  ;;  %463 = vmatpush3.bf16.msra.mxu1 %v478_v16 }
   0xc   :  { %464 = vmatprep.subr.bf16.mxu1 %v479_v17 }
   0xe   :  { %453 = vmatmul.mubr.msk.bf16.vlgmr.msra.gmra.mrb[0].mxu0 %vm60_vm0, %v565_v10 }
   0xf   :  { %456 = vmatprep.mubr.msk.bf16.mxu0 %vm60_vm0, %v567_v11  ;;  %465 = vmatpush3.bf16.msra.mxu1 %v479_v17 }
  0x16   :  { %457 = vmatmul.mubr.msk.bf16.gmra.mrb[4].mxu0 %vm60_vm0, %v579_v14 }
  0xe1   :  { %v454_v19 = vpop.f32.mrb[0].mxu0 }
  0xe2   :  { %v116_v20 = vadd.f32 %v454_v19, %v414_v18  ;;  %v107_v21 = vpop.f32.mrb[1].mxu0 }
  0xe3   :  { %v108_v22 = vadd.f32 %v414_v18, %v107_v21  ;;  %v455_v23 = vpop.f32.mrb[2].mxu0 }
  0xe4   :  { %v110_v24 = vpop.f32.mrb[3].mxu0  ;;  %v119_v25 = vadd.f32 %v455_v23, %v414_v18 }
  0xe5   :  { %480 = vtanh.f32 %v108_v22  ;;  %v111_v26 = vadd.f32 %v414_v18, %v110_v24 }
  0xe6   :  { %482 = vtanh.f32 %v116_v20 }
  0xe7   :  { %484 = vtanh.f32 %v111_v26 }
  0xe8   :  { %486 = vtanh.f32 %v119_v25 }
  0xe9   :  { %v458_v27 = vpop.f32.mrb[4].mxu0 }
  0xea   :  { %v132_v28 = vadd.f32 %v458_v27, %v414_v18  ;;  %v123_v29 = vpop.f32.mrb[5].mxu0 }
  0xeb   :  { %v124_v30 = vadd.f32 %v414_v18, %v123_v29  ;;  %v459_v31 = vpop.f32.mrb[6].mxu0 }
  0xec   :  { %v126_v32 = vpop.f32.mrb[7].mxu0  ;;  %v135_v33 = vadd.f32 %v459_v31, %v414_v18 }
  0xed   :  { %488 = vtanh.f32 %v124_v30  ;;  %v127_v34 = vadd.f32 %v414_v18, %v126_v32 }
  0xee   :  { %490 = vtanh.f32 %v132_v28 }
  0xef   :  { %v481_v35 = vpop.eup %480  ;;  %492 = vtanh.f32 %v127_v34 }
  0xf0   :  { %v483_v36 = vpop.eup %482  ;;  %494 = vtanh.f32 %v135_v33  ;;  %v147_v38 = vsel %vm146_vm1, %v481_v35, 0.0 }
  0xf1   :  { %v485_v37 = vpop.eup %484  ;;  %v150_v42 = vsel %vm146_vm1, %v483_v36, 0.0 }
  0xf2   :  { %v148_v39 = vsel %vm146_vm1, %v485_v37, 0.0  ;;  %v487_v40 = vpop.eup %486 }
  0xf3   :  { %v149_v41 = vadd.f32 %v148_v39, %v147_v38  ;;  %v152_v44 = vsel %vm146_vm1, %v487_v40, 0.0 }
  0xf5   :  { %v151_v43 = vadd.f32 %v150_v42, %v149_v41 }
  0xf7   :  { %v489_v45 = vpop.eup %488  ;;  %v153_v46 = vadd.f32 %v152_v44, %v151_v43  ;;  %v211_v44 = vlaneseq }
  0xf8   :  { %v491_v47 = vpop.eup %490  ;;  %v154_v48 = vsel %vm146_vm1, %v489_v45, 0.0 }
  0xf9   :  { %v493_v49 = vpop.eup %492  ;;  %v155_v50 = vadd.f32 %v154_v48, %v153_v46  ;;  %v158_v54 = vsel %vm146_vm1, %v491_v47, 0.0  ;;  %v29_v46 = vld [vmem:[%s677_s2 + $0x2] sm:$0x1] }
  0xfa   :  { %v156_v51 = vsel %vm146_vm1, %v493_v49, 0.0  ;;  %v495_v52 = vpop.eup %494 }
  0xfb   :  { %v157_v53 = vadd.f32 %v156_v51, %v155_v50  ;;  %v160_v56 = vsel %vm146_vm1, %v495_v52, 0.0 }
  0xfd   :  { %v159_v55 = vadd.f32 %v158_v54, %v157_v53 }
  0xff   :  { %v161_v57 = vadd.f32 %v160_v56, %v159_v55 }
 0x101   :  { %v162_v58 = vrot.slane %v161_v57, 4 }
 0x103   :  { %v163_v59 = vadd.f32 %v162_v58, %v161_v57 }
 0x105   :  { %v164_v60 = vrot.slane %v163_v59, 2 }
 0x107   :  { %v165_v61 = vadd.f32 %v164_v60, %v163_v59 }
 0x109   :  { %v166_v62 = vrot.slane %v165_v61, 1 }
 0x10b   :  { %v167_v63 = vadd.f32 %v166_v62, %v165_v61 }
 0x10d   :  { %v169_v0 = vmul.f32 0.015625, %v167_v63 }
 0x10f   :  { %v170_v1 = vsub.f32 %v481_v35, %v169_v0  ;;  %v171_v2 = vsub.f32 %v485_v37, %v169_v0  ;;  %v172_v3 = vsub.f32 %v483_v36, %v169_v0  ;;  %v173_v4 = vsub.f32 %v487_v40, %v169_v0 }
 0x110   :  { %v174_v6 = vsub.f32 %v489_v45, %v169_v0  ;;  %v175_v7 = vsub.f32 %v493_v49, %v169_v0  ;;  %v176_v8 = vsub.f32 %v491_v47, %v169_v0  ;;  %v177_v9 = vsub.f32 %v495_v52, %v169_v0 }
 0x111   :  { %v178_v12 = vmul.f32 %v170_v1, %v170_v1  ;;  %v179_v13 = vmul.f32 %v171_v2, %v171_v2  ;;  %v180_v15 = vmul.f32 %v172_v3, %v172_v3  ;;  %v181_v16 = vmul.f32 %v173_v4, %v173_v4 }
 0x112   :  { %v182_v20 = vmul.f32 %v174_v6, %v174_v6  ;;  %v183_v23 = vmul.f32 %v175_v7, %v175_v7  ;;  %v184_v26 = vmul.f32 %v176_v8, %v176_v8  ;;  %v185_v29 = vmul.f32 %v177_v9, %v177_v9 }
 0x113   :  { %v186_v17 = vsel %vm146_vm1, %v178_v12, 0.0  ;;  %v187_v18 = vsel %vm146_vm1, %v179_v13, 0.0  ;;  %v189_v21 = vsel %vm146_vm1, %v180_v15, 0.0  ;;  %v191_v24 = vsel %vm146_vm1, %v181_v16, 0.0 }
 0x114   :  { %v188_v19 = vadd.f32 %v187_v18, %v186_v17  ;;  %v193_v27 = vsel %vm146_vm1, %v182_v20, 0.0  ;;  %v195_v30 = vsel %vm146_vm1, %v183_v23, 0.0  ;;  %v197_v32 = vsel %vm146_vm1, %v184_v26, 0.0 }
 0x115   :  { %v199_v34 = vsel %vm146_vm1, %v185_v29, 0.0  ;;  %v212_v45 = vshrl.u32 %v211_v44, 7 }
 0x116   :  { %v190_v22 = vadd.f32 %v189_v21, %v188_v19  ;;  %v430_v19 = vld [vmem:[%s677_s2 + $0x3] ss:$0 sm:$0xff] }
 0x117   :  { %v213_v47 = vsub.s32 0, %v212_v45  ;;  %v431_v45 = vld [vmem:[%s677_s2 + $0x4] ss:$0 sm:$0xff] }
 0x118   :  { %v192_v25 = vadd.f32 %v191_v24, %v190_v22 }
 0x11a   :  { %v194_v28 = vadd.f32 %v193_v27, %v192_v25 }
 0x11c   :  { %v196_v31 = vadd.f32 %v195_v30, %v194_v28 }
 0x11e   :  { %v198_v33 = vadd.f32 %v197_v32, %v196_v31 }
 0x120   :  { %v200_v35 = vadd.f32 %v199_v34, %v198_v33 }
 0x122   :  { %v201_v36 = vrot.slane %v200_v35, 4 }
 0x124   :  { %v202_v37 = vadd.f32 %v201_v36, %v200_v35 }
 0x126   :  { %v203_v38 = vrot.slane %v202_v37, 2 }
 0x128   :  { %v204_v39 = vadd.f32 %v203_v38, %v202_v37 }
 0x12a   :  { %v205_v40 = vrot.slane %v204_v39, 1 }
 0x12c   :  { %v206_v41 = vadd.f32 %v205_v40, %v204_v39 }
 0x12e   :  { %v207_v42 = vmul.f32 0.015625, %v206_v41 }
 0x130   :  { %v208_v43 = vadd.f32 1e-05, %v207_v42 }
 0x132   :  { %496 = vrsqrt.f32 %v208_v43 }
 0x13c   :  { %v497_v48 = vpop.eup %496 }
 0x13d   :  { %v210_v49 = vmul.f32 %v497_v48, %v29_v46 }
 0x13f   :  { %v214_v50 = vrot.slane %v210_v49, %v213_v47 }
 0x141   :  { %v215_v51 = vmul.f32 %v214_v50, %v170_v1  ;;  %v216_v52 = vmul.f32 %v214_v50, %v171_v2  ;;  %v217_v53 = vmul.f32 %v214_v50, %v172_v3  ;;  %v218_v54 = vmul.f32 %v214_v50, %v173_v4 }
 0x142   :  { %v219_v55 = vmul.f32 %v214_v50, %v174_v6  ;;  %v220_v56 = vmul.f32 %v214_v50, %v175_v7  ;;  %v221_v57 = vmul.f32 %v214_v50, %v176_v8  ;;  %v222_v58 = vmul.f32 %v214_v50, %v177_v9 }
 0x143   :  { %v223_v59 = vpack.c.bf16 %v216_v52, %v215_v51  ;;  %v224_v60 = vpack.c.bf16 %v218_v54, %v217_v53 }
 0x144   :  { %v225_v61 = vpack.c.bf16 %v220_v56, %v219_v55  ;;  %v226_v62 = vpack.c.bf16 %v222_v58, %v221_v57 }
 0x145   :  { %227 = vst.msk [vmem:[#allocation2] sm:$0xff] %vm146_vm1, %v223_v59  ;;  %228 = vst.msk [vmem:[#allocation2 + $0x8] sm:$0xff] %vm146_vm1, %v224_v60 }
 0x146   :  { %229 = vst.msk [vmem:[#allocation2 + $0x10] sm:$0xff] %vm146_vm1, %v225_v61  ;;  %230 = vst.msk [vmem:[#allocation2 + $0x18] sm:$0xff] %vm146_vm1, %v226_v62 }
 0x147   :  { %232 = vst.msk [vmem:[#allocation2] sm:$0xff] %vm231_vm2, %v549_v5  ;;  %233 = vst.msk [vmem:[#allocation2 + $0x8] sm:$0xff] %vm231_vm2, %v565_v10  ;;  %v422_v5 = vld [vmem:[%s677_s2 + $0x1] ss:$0 sm:$0xff] }
 0x148   :  { %234 = vst.msk [vmem:[#allocation2 + $0x10] sm:$0xff] %vm231_vm2, %v567_v11  ;;  %235 = vst.msk [vmem:[#allocation2 + $0x18] sm:$0xff] %vm231_vm2, %v579_v14 }
 0x14e   :  { %v236_v63 = vld [vmem:[#allocation2] sm:$0xff]  ;;  %v237_v0 = vld [vmem:[#allocation2 + $0x8] sm:$0xff] }
 0x14f   :  { %466 = vmatprep.mubr.msk.bf16.mxu1 %vm60_vm0, %v236_v63  ;;  %v238_v1 = vld [vmem:[#allocation2 + $0x10] sm:$0xff]  ;;  %v239_v2 = vld [vmem:[#allocation2 + $0x18] sm:$0xff] }
 0x150   :  { %467 = vmatmul.mubr.msk.bf16.vlgmr.msra.gmra.mrb[0].mxu1 %vm60_vm0, %v237_v0 }
 0x151   :  { %470 = vmatprep.mubr.msk.bf16.mxu1 %vm60_vm0, %v238_v1 }
 0x158   :  { %471 = vmatmul.mubr.msk.bf16.gmra.mrb[4].mxu1 %vm60_vm0, %v239_v2 }
 0x223   :  { %v468_v10 = vpop.f32.mrb[0].mxu1 }
 0x224   :  { %v323_v11 = vadd.f32 %v468_v10, %v422_v5  ;;  %v314_v3 = vpop.f32.mrb[1].mxu1 }
 0x225   :  { %v315_v14 = vadd.f32 %v422_v5, %v314_v3  ;;  %v469_v4 = vpop.f32.mrb[2].mxu1 }
 0x226   :  { %498 = vtanh.f32 %v323_v11  ;;  %v326_v6 = vadd.f32 %v469_v4, %v422_v5  ;;  %v317_v7 = vpop.f32.mrb[3].mxu1 }
 0x227   :  { %500 = vtanh.f32 %v315_v14  ;;  %v318_v8 = vadd.f32 %v422_v5, %v317_v7 }
 0x228   :  { %502 = vtanh.f32 %v326_v6 }
 0x229   :  { %504 = vtanh.f32 %v318_v8 }
 0x22b   :  { %v472_v9 = vpop.f32.mrb[4].mxu1 }
 0x22c   :  { %v339_v12 = vadd.f32 %v472_v9, %v422_v5  ;;  %v330_v13 = vpop.f32.mrb[5].mxu1 }
 0x22d   :  { %v331_v15 = vadd.f32 %v422_v5, %v330_v13  ;;  %v473_v16 = vpop.f32.mrb[6].mxu1 }
 0x22e   :  { %506 = vtanh.f32 %v339_v12  ;;  %v342_v17 = vadd.f32 %v473_v16, %v422_v5  ;;  %v333_v18 = vpop.f32.mrb[7].mxu1 }
 0x22f   :  { %508 = vtanh.f32 %v331_v15  ;;  %v334_v20 = vadd.f32 %v422_v5, %v333_v18 }
 0x230   :  { %v499_v21 = vpop.eup %498  ;;  %510 = vtanh.f32 %v342_v17 }
 0x231   :  { %v501_v22 = vpop.eup %500  ;;  %512 = vtanh.f32 %v334_v20  ;;  %v359_v23 = vmul.f32 %v499_v21, %v430_v19 }
 0x232   :  { %v503_v24 = vpop.eup %502  ;;  %v357_v25 = vmul.f32 %v501_v22, %v430_v19 }
 0x233   :  { %v505_v26 = vpop.eup %504  ;;  %v371_v27 = vsel %vm146_vm1, %v359_v23, 0.0  ;;  %v360_v28 = vmul.f32 %v503_v24, %v430_v19 }
 0x234   :  { %372 = vadd.xlane.f32.xlu1 %v371_v27  ;;  %v365_v29 = vsel %vm146_vm1, %v357_v25, 0.0  ;;  %v358_v30 = vmul.f32 %v505_v26, %v430_v19 }
 0x235   :  { %366 = vadd.xlane.f32.xlu0 %v365_v29  ;;  %v374_v31 = vsel %vm146_vm1, %v360_v28, 0.0 }
 0x236   :  { %v368_v33 = vsel %vm146_vm1, %v358_v30, 0.0 }
 0x238   :  { %v507_v32 = vpop.eup %506  ;;  %375 = vadd.xlane.f32.xlu1 %v374_v31 }
 0x239   :  { %v509_v34 = vpop.eup %508  ;;  %369 = vadd.xlane.f32.xlu0 %v368_v33  ;;  %v363_v40 = vmul.f32 %v507_v32, %v430_v19 }
 0x23a   :  { %v511_v35 = vpop.eup %510  ;;  %v361_v36 = vmul.f32 %v509_v34, %v430_v19 }
 0x23b   :  { %v513_v37 = vpop.eup %512  ;;  %v364_v42 = vmul.f32 %v511_v35, %v430_v19  ;;  %v383_v43 = vsel %vm146_vm1, %v363_v40, 0.0 }
 0x23c   :  { %v377_v38 = vsel %vm146_vm1, %v361_v36, 0.0  ;;  %v362_v39 = vmul.f32 %v513_v37, %v430_v19 }
 0x23d   :  { %378 = vadd.xlane.f32.xlu0 %v377_v38  ;;  %v386_v44 = vsel %vm146_vm1, %v364_v42, 0.0 }
 0x23e   :  { %v380_v41 = vsel %vm146_vm1, %v362_v39, 0.0 }
 0x23f   :  { %381 = vadd.xlane.f32.xlu1 %v380_v41 }
 0x241   :  { %384 = vadd.xlane.f32.xlu0 %v383_v43 }
 0x243   :  { %387 = vadd.xlane.f32.xlu1 %v386_v44 }
 0x2c1   :  { %v373_v46 = vpop.xlane.xlu1 %372 }
 0x2c2   :  { %v395_v47 = vadd.f32 %v431_v45, %v373_v46  ;;  %v367_v48 = vpop.xlane.xlu0 %366 }
 0x2c3   :  { %v393_v49 = vadd.f32 %v431_v45, %v367_v48 }
 0x2c4   :  { %404 = vst.msk [vmem:[%s678_s3 + $0x10] sm:$0xff] %vm401_vm3, %v395_v47 }
 0x2c5   :  { %402 = vst.msk [vmem:[%s678_s3] sm:$0xff] %vm401_vm3, %v393_v49  ;;  %v376_v50 = vpop.xlane.xlu1 %375 }
 0x2c6   :  { %v396_v51 = vadd.f32 %v431_v45, %v376_v50  ;;  %v370_v52 = vpop.xlane.xlu0 %369 }
 0x2c7   :  { %v394_v53 = vadd.f32 %v431_v45, %v370_v52 }
 0x2c8   :  { %405 = vst.msk [vmem:[%s678_s3 + $0x18] sm:$0xff] %vm401_vm3, %v396_v51 }
 0x2c9   :  { %403 = vst.msk [vmem:[%s678_s3 + $0x8] sm:$0xff] %vm401_vm3, %v394_v53 }
 0x2ca   :  { %v379_v54 = vpop.xlane.xlu0 %378 }
 0x2cb   :  { %v397_v55 = vadd.f32 %v431_v45, %v379_v54 }
 0x2cc   :  { %v382_v56 = vpop.xlane.xlu1 %381 }
 0x2cd   :  { %406 = vst.msk [vmem:[%s678_s3 + $0x20] sm:$0xff] %vm401_vm3, %v397_v55  ;;  %v398_v57 = vadd.f32 %v431_v45, %v382_v56 }
 0x2ce   :  { %v385_v58 = vpop.xlane.xlu0 %384 }
 0x2cf   :  { %407 = vst.msk [vmem:[%s678_s3 + $0x28] sm:$0xff] %vm401_vm3, %v398_v57  ;;  %v399_v59 = vadd.f32 %v431_v45, %v385_v58 }
 0x2d0   :  { %v388_v60 = vpop.xlane.xlu1 %387 }
 0x2d1   :  { %408 = vst.msk [vmem:[%s678_s3 + $0x30] sm:$0xff] %vm401_vm3, %v399_v59  ;;  %v400_v61 = vadd.f32 %v431_v45, %v388_v60 }
 0x2d3   :  { %409 = vst.msk [vmem:[%s678_s3 + $0x38] sm:$0xff] %vm401_vm3, %v400_v61 }

</bundles_post_ra>
